<compile_context>
chip_gen: v7x
topology: tpu7x:2x2x1
jax: 0.10.0
libtpu: 0.0.40
codegen_flags: <defaults>
</compile_context>

<pallas_src>
import functools

import jax
import jax.numpy as jnp
from jax.experimental import pallas as pl
from jax.experimental.pallas import tpu as pltpu


_LANE = 128              # lane width (last-dim tile)
_SUBLANE = 8             # f32 sublane tile
_TILE_ROWS = 2048        # packed output rows per grid step (~1 MiB f32 block)
_FAST_PATH_TOKENS = 256  # below this, skip Pallas and use jnp.take


def _round_up(x, m):
    return ((x + m - 1) // m) * m


def _embedding_kernel(idx_ref, w_ref, o_ref):
    # idx_ref: (pack, tile_rows) int32 -- combined ids c = j*vocab_pad + idx,
    #                                     or K (= no match) for pad / OOR ids.
    # w_ref  : (K, 128) f32            -- block-replicated table (VMEM resident)
    # o_ref  : (tile_rows, 128) f32    -- pack tokens per lane-dense row
    k_dim = w_ref.shape[0]
    pack, tile_rows = idx_ref.shape

    row_iota = jax.lax.broadcasted_iota(jnp.int32, (k_dim, tile_rows), 0)
    # Grouped one-hot (transposed): onehot_t[k, r] = 1 iff some token j of
    # packed row r has combined id k.  Built with `pack` broadcast compares of
    # a (1, tile_rows) lane-major id row against the sublane iota (no in-kernel
    # transpose / gather needed).  pack is a small static int -> unrolled.
    onehot_t = (row_iota == idx_ref[pl.ds(0, 1), :]).astype(w_ref.dtype)
    for j in range(1, pack):
        onehot_t = onehot_t + (row_iota == idx_ref[pl.ds(j, 1), :]).astype(w_ref.dtype)

    # out[r, :] = sum_k onehot_t[k, r] * W_blk[k, :]   (A^T @ B on the MXU)
    o_ref[...] = jax.lax.dot_general(
        onehot_t,
        w_ref[...],
        dimension_numbers=(((0,), (0,)), ((), ())),
        preferred_element_type=jnp.float32,
    ).astype(o_ref.dtype)


@functools.partial(jax.jit, static_argnames=("pack", "vocab_size", "vocab_pad"))
def _embedding_lookup(idx_padded, w_blk, *, pack, vocab_size, vocab_pad):
    # idx_padded: (r_total * pack,) int32 raw vocab ids (pad / invalid = -1)
    # w_blk     : (pack * vocab_pad, d_pad) f32 block-replicated table
    total = idx_padded.shape[0]
    r_total = total // pack
    k_dim, d_pad = w_blk.shape

    # Combined ids in grouped (pack, r_total) layout; anything out of range
    # (including the -1 padding) maps to k_dim, which never matches the iota.
    idx2 = idx_padded.reshape(r_total, pack).T                      # (pack, r_total)
    jcol = (jnp.arange(pack, dtype=jnp.int32) * vocab_pad)[:, None]  # (pack, 1)
    valid = (idx2 >= 0) & (idx2 < vocab_size)
    c = jnp.where(valid, idx2 + jcol, k_dim).astype(jnp.int32)

    tile_rows = min(_TILE_ROWS, r_total)   # r_total is a pow2-based bucket -> divides
    num_tiles = r_total // tile_rows

    # Realistic VMEM budget: double-buffered blocks + one-hot/iota temporaries.
    block_bytes = (tile_rows * d_pad + pack * tile_rows + k_dim * d_pad) * 4
    tmp_bytes = 2 * k_dim * tile_rows * 4
    vmem_limit = int(2 * block_bytes + tmp_bytes + (2 << 20))
    vmem_limit = max(8 << 20, min(vmem_limit, 32 << 20))

    cost = pl.CostEstimate(
        flops=2 * k_dim * r_total * d_pad,
        transcendentals=0,
        bytes_accessed=(c.size * 4 + w_blk.size * 4 + r_total * d_pad * 4),
    )

    return pl.pallas_call(
        _embedding_kernel,
        out_shape=jax.ShapeDtypeStruct((r_total, d_pad), w_blk.dtype),
        grid=(num_tiles,),
        in_specs=[
            pl.BlockSpec((pack, tile_rows), lambda i: (0, i)),  # grouped ids
            pl.BlockSpec((k_dim, d_pad), lambda i: (0, 0)),     # full table
        ],
        out_specs=pl.BlockSpec((tile_rows, d_pad), lambda i: (i, 0)),
        compiler_params=pltpu.CompilerParams(
            dimension_semantics=("parallel",),
            vmem_limit_bytes=vmem_limit,
        ),
        cost_estimate=cost,
    )(c, w_blk)


class FeatureEmbedding:
    """JAX/Pallas port of allenact's FeatureEmbedding.

    output_size != 0 -> behaves like nn.Embedding(input_size, output_size)
                        (N(0,1)-initialized table, row gather).
    output_size == 0 -> returns an empty (0,) float32 array (null embedding).

    Note: out-of-range / negative indices produce an all-zeros embedding row
    (both the Pallas path and the jnp.take fast path) rather than PyTorch's
    error — a documented deviation from nn.Embedding.
    """

    def __init__(self, input_size, output_size, key=None):
        self.input_size = int(input_size)
        self.output_size = int(output_size)
        if self.output_size == 0:
            self.null_embedding = jnp.zeros((0,), dtype=jnp.float32)
            return

        if key is None:
            key = jax.random.PRNGKey(0)
        # Deterministic init (nn.Embedding default is N(0, 1)).
        self.weight = jax.random.normal(
            key, (self.input_size, self.output_size), dtype=jnp.float32
        )

        # Packing: floor-pack tokens into a 128-lane row when output_size
        # divides 128 exactly (zero lane padding, free unpack reshape).
        # Otherwise fall back to pack=1 with lane padding + a lane slice.
        self._vocab_pad = _round_up(self.input_size, _SUBLANE)
        if self.output_size <= _LANE and _LANE % self.output_size == 0:
            self._pack = _LANE // self.output_size
            self._d_pad = _LANE
        else:
            self._pack = 1
            self._d_pad = _round_up(self.output_size, _LANE)

        # Block-replicated table: W_blk[j*vocab_pad + v, j*D:(j+1)*D] = W[v].
        w_blk = jnp.zeros((self._pack * self._vocab_pad, self._d_pad),
                          dtype=jnp.float32)
        for j in range(self._pack):
            w_blk = w_blk.at[
                j * self._vocab_pad: j * self._vocab_pad + self.input_size,
                j * self.output_size: (j + 1) * self.output_size,
            ].set(self.weight)
        self._weight_packed = w_blk

    def __call__(self, inputs):
        if self.output_size == 0:
            return self.null_embedding

        inputs = jnp.asarray(inputs)
        orig_shape = inputs.shape
        idx = inputs.reshape(-1).astype(jnp.int32)
        n = idx.shape[0]
        if n == 0:
            return jnp.zeros(orig_shape + (self.output_size,), dtype=jnp.float32)

        # Small inputs: plain XLA gather beats any kernel-launch overhead.
        if n <= _FAST_PATH_TOKENS:
            return jnp.take(self.weight, inputs.astype(jnp.int32), axis=0,
                            mode="fill", fill_value=0.0)

        pack = self._pack
        n_rows = -(-n // pack)
        # Bucket the packed row count (bounded number of Mosaic compiles):
        # power of two below one tile, power-of-two multiple of the tile above
        # (=> even tile counts for the multi-tile "parallel" grid).
        if n_rows <= _TILE_ROWS:
            r_total = max(_SUBLANE, pl.next_power_of_2(n_rows))
        else:
            r_total = _TILE_ROWS * pl.next_power_of_2(-(-n_rows // _TILE_ROWS))
        n_padded = r_total * pack
        if n_padded != n:
            idx = jnp.pad(idx, (0, n_padded - n), constant_values=-1)

        out = _embedding_lookup(
            idx, self._weight_packed,
            pack=pack, vocab_size=self.input_size, vocab_pad=self._vocab_pad,
        )  # (r_total, d_pad)

        if pack > 1:
            # pack * output_size == 128 -> row-major bitcast reshape (free).
            out = out.reshape(n_padded, self.output_size)
            if n_padded != n:
                out = out[:n]
        else:
            if n_padded != n or self._d_pad != self.output_size:
                out = out[:n, : self.output_size]
        return out.reshape(*orig_shape, self.output_size)


if __name__ == "__main__":
    key = jax.random.PRNGKey(0)
    k_w, k1, k2, k3 = jax.random.split(key, 4)

    input_size = 16    # vocab (e.g. number of actions)
    output_size = 32   # embedding dim -> pack = 4 tokens per 128-lane row
    emb = FeatureEmbedding(input_size, output_size, key=k_w)

    # Small case: jnp.take fast path.
    x_small = jax.random.randint(k1, (2, 8), 0, input_size, dtype=jnp.int32)
    out_small = jax.block_until_ready(emb(x_small))
    assert out_small.shape == (2, 8, output_size)
    assert out_small.dtype == jnp.float32
    assert jnp.allclose(out_small, jnp.take(emb.weight, x_small, axis=0),
                        atol=1e-6, rtol=1e-6)

    # Medium case: Pallas path, single tile, exercises -1 padding + row trim.
    x_med = jax.random.randint(k2, (4, 300), 0, input_size, dtype=jnp.int32)
    out_med = jax.block_until_ready(emb(x_med))
    assert out_med.shape == (4, 300, output_size)
    assert jnp.allclose(out_med, jnp.take(emb.weight, x_med, axis=0),
                        atol=1e-5, rtol=1e-5)

    # Larger case: Pallas path with a 2-step "parallel" grid (multi-tile).
    x_big = jax.random.randint(k3, (16, 600), 0, input_size, dtype=jnp.int32)
    out_big = jax.block_until_ready(emb(x_big))
    assert out_big.shape == (16, 600, output_size)
    assert jnp.allclose(out_big, jnp.take(emb.weight, x_big, axis=0),
                        atol=1e-5, rtol=1e-5)

    # Zero-output (null embedding) path.
    emb0 = FeatureEmbedding(input_size, 0)
    out0 = jax.block_until_ready(emb0(x_small))
    assert out0.shape == (0,)

    print("KERNEL_OK")
</pallas_src>

<mosaic_0001>
module attributes {stable_mosaic.version = 11 : i64} {
  func.func @_embedding_kernel(%arg0: i32, %arg1: memref<4x512xi32, #tpu.memory_space<vmem>>, %arg2: memref<64x128xf32, #tpu.memory_space<vmem>>, %arg3: memref<512x128xf32, #tpu.memory_space<vmem>>) attributes {dimension_semantics = [#tpu.dimension_semantics<parallel>], iteration_bounds = array<i64: 1>, scalar_prefetch = 0 : i64, scratch_operands = 0 : i64, tpu.core_type = #tpu.core_type<tc>, window_params = [{transform_indices = @transform_0, window_bounds = array<i64: 4, 512>}, {pipeline_mode = #tpu.pipeline_mode<synchronous>, transform_indices = @transform_1, window_bounds = array<i64: 64, 128>}, {transform_indices = @transform_2, window_bounds = array<i64: 512, 128>}]} {
    %0 = tpu.iota {dimensions = array<i32: 0>} : vector<64x512xi32>
    %c0 = arith.constant 0 : index
    %c0_0 = arith.constant 0 : index
    %1 = vector.load %arg1[%c0, %c0_0] : memref<4x512xi32, #tpu.memory_space<vmem>>, vector<1x512xi32>
    %2 = vector.broadcast %1 : vector<1x512xi32> to vector<64x512xi32>
    %3 = arith.cmpi eq, %0, %2 : vector<64x512xi32>
    %4 = arith.extui %3 : vector<64x512xi1> to vector<64x512xi32>
    %5 = arith.sitofp %4 : vector<64x512xi32> to vector<64x512xf32>
    %c1 = arith.constant 1 : index
    %c0_1 = arith.constant 0 : index
    %6 = vector.load %arg1[%c1, %c0_1] : memref<4x512xi32, #tpu.memory_space<vmem>>, vector<1x512xi32>
    %7 = vector.broadcast %6 : vector<1x512xi32> to vector<64x512xi32>
    %8 = arith.cmpi eq, %0, %7 : vector<64x512xi32>
    %9 = arith.extui %8 : vector<64x512xi1> to vector<64x512xi32>
    %10 = arith.sitofp %9 : vector<64x512xi32> to vector<64x512xf32>
    %11 = arith.addf %5, %10 : vector<64x512xf32>
    %c2 = arith.constant 2 : index
    %c0_2 = arith.constant 0 : index
    %12 = vector.load %arg1[%c2, %c0_2] : memref<4x512xi32, #tpu.memory_space<vmem>>, vector<1x512xi32>
    %13 = vector.broadcast %12 : vector<1x512xi32> to vector<64x512xi32>
    %14 = arith.cmpi eq, %0, %13 : vector<64x512xi32>
    %15 = arith.extui %14 : vector<64x512xi1> to vector<64x512xi32>
    %16 = arith.sitofp %15 : vector<64x512xi32> to vector<64x512xf32>
    %17 = arith.addf %11, %16 : vector<64x512xf32>
    %c3 = arith.constant 3 : index
    %c0_3 = arith.constant 0 : index
    %18 = vector.load %arg1[%c3, %c0_3] : memref<4x512xi32, #tpu.memory_space<vmem>>, vector<1x512xi32>
    %19 = vector.broadcast %18 : vector<1x512xi32> to vector<64x512xi32>
    %20 = arith.cmpi eq, %0, %19 : vector<64x512xi32>
    %21 = arith.extui %20 : vector<64x512xi1> to vector<64x512xi32>
    %22 = arith.sitofp %21 : vector<64x512xi32> to vector<64x512xf32>
    %23 = arith.addf %17, %22 : vector<64x512xf32>
    %c0_4 = arith.constant 0 : index
    %c0_5 = arith.constant 0 : index
    %24 = vector.load %arg2[%c0_4, %c0_5] : memref<64x128xf32, #tpu.memory_space<vmem>>, vector<64x128xf32>
    %cst = arith.constant dense<0.000000e+00> : vector<512x128xf32>
    %25 = tpu.matmul %23, %24, %cst {dimension_numbers = #tpu.dot_dimension_numbers<[0], [0], [1], [1], [0, 1, 1, 1], [], []>} : vector<64x512xf32>, vector<64x128xf32>, vector<512x128xf32> -> vector<512x128xf32>
    %c0_6 = arith.constant 0 : index
    %c0_7 = arith.constant 0 : index
    %26 = vector.load %arg3[%c0_6, %c0_7] : memref<512x128xf32, #tpu.memory_space<vmem>>, vector<512x128xf32>
    tpu.vector_store %arg3[%c0_6, %c0_7], %25 {strides = array<i32>} : memref<512x128xf32, #tpu.memory_space<vmem>>, vector<512x128xf32>,
    return
  }
  func.func @transform_0(%arg0: i32) -> (i32, i32) {
    %c0_i32 = arith.constant 0 : i32
    %c0_i32_0 = arith.constant 0 : i32
    return %c0_i32, %arg0 : i32, i32
  }
  func.func @transform_1(%arg0: i32) -> (i32, i32) {
    %c0_i32 = arith.constant 0 : i32
    %c0_i32_0 = arith.constant 0 : i32
    %c0_i32_1 = arith.constant 0 : i32
    return %c0_i32, %c0_i32_0 : i32, i32
  }
  func.func @transform_2(%arg0: i32) -> (i32, i32) {
    %c0_i32 = arith.constant 0 : i32
    %c0_i32_0 = arith.constant 0 : i32
    return %arg0, %c0_i32 : i32, i32
  }
}

</mosaic_0001>

<bundles_post_ra>
// kernel: _embedding_lookup.1
= control target key start
LH: loop header
LB: loop body
LE: loop exit
PB: predicated region body
PF: predicated region fallthrough
CT: control target
= control target key end

     0   :  { %v12_v0 = vlaneseq  ;;  %s2425_s0 = inlined_call_operand.vmem [shape: s32[4,512], index: 0, kind: input, shape index: {}]   ;;  %s2426_s1 = inlined_call_operand.vmem [shape: f32[64,128], index: 1, kind: input, shape index: {}]   ;;  %s2427_s2 = inlined_call_operand.hbm [shape: f32[512,128], index: 2, kind: output, shape index: {}]  }
   0x1   :  { %v572_v1 = vld [vmem:[%s2426_s1] sm:$0xff]  ;;  %v573_v2 = vld [vmem:[%s2426_s1 + $0x8] sm:$0xff]  ;;  %v574_v8 = vld [vmem:[%s2426_s1 + $0x10] sm:$0xff] }
   0x2   :  { %v1825_v3 = vld [vmem:[%s2425_s0] ss:$4 sm:$0xf]  ;;  %v1830_v4 = vld [vmem:[%s2425_s0 + $0x1] ss:$4 sm:$0xf]  ;;  %v1745_v5 = vpack.c.bf16 %v573_v2, %v572_v1 }
   0x3   :  { %v1832_v6 = vshrl.u32 %v12_v0, 7  ;;  %v1837_v7 = vld [vmem:[%s2425_s0 + $0x2] ss:$4 sm:$0xf]  ;;  %v575_v9 = vld [vmem:[%s2426_s1 + $0x18] sm:$0xff] }
   0x4   :  { %v1848_v10 = vld [vmem:[%s2425_s0 + $0x3] ss:$4 sm:$0xf]  ;;  %1746 = vmatprep.subr.bf16.mxu0 %v1745_v5  ;;  %1761 = vmatprep.subr.bf16.mxu1 %v1745_v5  ;;  %v1749_v11 = vpack.c.bf16 %v575_v9, %v574_v8 }
   0x5   :  { %7 = vsyncpa [#allocation3], 0  ;;  %v32_v12 = vsub.s32 2, %v1832_v6  ;;  %v24_v13 = vsub.s32 0, %v1832_v6  ;;  %v1853_v14 = vadd.s32 8, %v1832_v6  ;;  %v1856_v15 = vadd.s32 16, %v1832_v6  ;;  %1748 = vmatpush3.bf16.msra.mxu0 %v1745_v5  ;;  %1765 = vmatpush3.bf16.msra.mxu1 %v1745_v5 }
   0x6   :  { %v1859_v16 = vadd.s32 24, %v1832_v6  ;;  %v1862_v17 = vadd.s32 32, %v1832_v6  ;;  %v1865_v18 = vadd.s32 40, %v1832_v6  ;;  %v1868_v19 = vadd.s32 48, %v1832_v6  ;;  %1750 = vmatprep.subr.bf16.mxu0 %v1749_v11  ;;  %1762 = vmatprep.subr.bf16.mxu1 %v1749_v11 }
   0x7   :  { %v1871_v20 = vrot.slane %v1825_v3, %v32_v12  ;;  %v1874_v21 = vrot.slane %v1830_v4, %v32_v12  ;;  %v1877_v22 = vrot.slane %v1837_v7, %v32_v12  ;;  %v1880_v23 = vrot.slane %v1848_v10, %v32_v12 }
   0x8   :  { %v1883_v24 = vrot.slane %v1825_v3, %v24_v13  ;;  %v1886_v25 = vrot.slane %v1830_v4, %v24_v13  ;;  %v1889_v26 = vrot.slane %v1837_v7, %v24_v13  ;;  %v1892_v27 = vrot.slane %v1848_v10, %v24_v13 }
   0x9   :  { %vm40_vm0 = vcmp.eq.s32.totalorder %v1832_v6, %v1871_v20  ;;  %vm154_vm1 = vcmp.eq.s32.totalorder %v1832_v6, %v1874_v21  ;;  %vm300_vm2 = vcmp.eq.s32.totalorder %v1832_v6, %v1877_v22  ;;  %vm446_vm3 = vcmp.eq.s32.totalorder %v1832_v6, %v1880_v23  ;;  %1752 = vmatpush3.bf16.msra.mxu0 %v1749_v11 }
   0xa   :  { %v1797_v28 = vmov 0.0   ;;  %1766 = vmatpush3.bf16.msra.mxu1 %v1749_v11  ;;  %vm38_vm4 = vcmp.eq.s32.totalorder %v1832_v6, %v1883_v24  ;;  %vm152_vm5 = vcmp.eq.s32.totalorder %v1832_v6, %v1886_v25  ;;  %vm298_vm6 = vcmp.eq.s32.totalorder %v1832_v6, %v1889_v26 }
   0xb   :  { %v1368_v29 = vsel %vm40_vm0, 1.0, %v1797_v28  ;;  %v1401_v30 = vsel %vm154_vm1, 1.0, %v1797_v28  ;;  %v1434_v31 = vsel %vm300_vm2, 1.0, %v1797_v28  ;;  %v1467_v32 = vsel %vm446_vm3, 1.0, %v1797_v28 }
   0xc   :  { %v250_v33 = vadd.f32 %v1401_v30, %v1368_v29  ;;  %v1366_v34 = vsel %vm38_vm4, 1.0, %v1797_v28  ;;  %v1399_v35 = vsel %vm152_vm5, 1.0, %v1797_v28  ;;  %v1432_v36 = vsel %vm298_vm6, 1.0, %v1797_v28 }
   0xd   :  { %vm444_vm7 = vcmp.eq.s32.totalorder %v1832_v6, %v1892_v27  ;;  %v248_v38 = vadd.f32 %v1399_v35, %v1366_v34  ;;  %vm44_vm8 = vcmp.eq.s32.totalorder %v1853_v14, %v1871_v20  ;;  %vm158_vm9 = vcmp.eq.s32.totalorder %v1853_v14, %v1874_v21 }
   0xe   :  { %v396_v37 = vadd.f32 %v1434_v31, %v250_v33  ;;  %v1465_v39 = vsel %vm444_vm7, 1.0, %v1797_v28  ;;  %v1372_v40 = vsel %vm44_vm8, 1.0, %v1797_v28  ;;  %vm304_vm10 = vcmp.eq.s32.totalorder %v1853_v14, %v1877_v22 }
   0xf   :  { %vm450_vm11 = vcmp.eq.s32.totalorder %v1853_v14, %v1880_v23  ;;  %v394_v42 = vadd.f32 %v1432_v36, %v248_v38  ;;  %v1405_v43 = vsel %vm158_vm9, 1.0, %v1797_v28  ;;  %v1438_v44 = vsel %vm304_vm10, 1.0, %v1797_v28 }
  0x10   :  { %v542_v41 = vadd.f32 %v1467_v32, %v396_v37  ;;  %v254_v45 = vadd.f32 %v1405_v43, %v1372_v40  ;;  %v1471_v46 = vsel %vm450_vm11, 1.0, %v1797_v28  ;;  %vm42_vm12 = vcmp.eq.s32.totalorder %v1853_v14, %v1883_v24 }
  0x11   :  { %vm156_vm13 = vcmp.eq.s32.totalorder %v1853_v14, %v1886_v25  ;;  %v540_v47 = vadd.f32 %v1465_v39, %v394_v42  ;;  %v1370_v48 = vsel %vm42_vm12, 1.0, %v1797_v28  ;;  %vm302_vm14 = vcmp.eq.s32.totalorder %v1853_v14, %v1889_v26 }
  0x12   :  { %644 = vxpose.xlu1.b32.start [1/8] (short) %v542_v41, 128  ;;  %v1403_v49 = vsel %vm156_vm13, 1.0, %v1797_v28  ;;  %v400_v50 = vadd.f32 %v1438_v44, %v254_v45  ;;  %v1436_v52 = vsel %vm302_vm14, 1.0, %v1797_v28  ;;  %vm448_vm15 = vcmp.eq.s32.totalorder %v1853_v14, %v1892_v27 }
  0x13   :  { %v252_v51 = vadd.f32 %v1403_v49, %v1370_v48  ;;  %580 = vxpose.xlu0.b32.start [1/8] (short) %v540_v47, 128  ;;  %v1469_v53 = vsel %vm448_vm15, 1.0, %v1797_v28  ;;  %vm48_vm0 = vcmp.eq.s32.totalorder %v1856_v15, %v1871_v20  ;;  %vm162_vm1 = vcmp.eq.s32.totalorder %v1856_v15, %v1874_v21 }
  0x14   :  { %vm308_vm2 = vcmp.eq.s32.totalorder %v1856_v15, %v1877_v22  ;;  %v546_v54 = vadd.f32 %v1471_v46, %v400_v50  ;;  %v1376_v56 = vsel %vm48_vm0, 1.0, %v1797_v28  ;;  %v1409_v57 = vsel %vm162_vm1, 1.0, %v1797_v28 }
  0x15   :  { %v398_v55 = vadd.f32 %v1436_v52, %v252_v51  ;;  %v258_v58 = vadd.f32 %v1409_v57, %v1376_v56  ;;  %v1442_v59 = vsel %vm308_vm2, 1.0, %v1797_v28  ;;  %vm454_vm3 = vcmp.eq.s32.totalorder %v1856_v15, %v1880_v23 }
  0x16   :  { %vm46_vm4 = vcmp.eq.s32.totalorder %v1856_v15, %v1883_v24  ;;  %645 = vxpose.xlu1.b32.cont [2/8] (short) %v546_v54, 128  ;;  %v1475_v61 = vsel %vm454_vm3, 1.0, %v1797_v28  ;;  %vm160_vm5 = vcmp.eq.s32.totalorder %v1856_v15, %v1886_v25  ;;  %vm306_vm6 = vcmp.eq.s32.totalorder %v1856_v15, %v1889_v26 }
  0x17   :  { %v544_v60 = vadd.f32 %v1469_v53, %v398_v55  ;;  %v1374_v62 = vsel %vm46_vm4, 1.0, %v1797_v28  ;;  %v404_v63 = vadd.f32 %v1442_v59, %v258_v58  ;;  %v1407_v0 = vsel %vm160_vm5, 1.0, %v1797_v28 }
  0x18   :  { %vm452_vm7 = vcmp.eq.s32.totalorder %v1856_v15, %v1892_v27  ;;  %v256_v1 = vadd.f32 %v1407_v0, %v1374_v62  ;;  %v1440_v2 = vsel %vm306_vm6, 1.0, %v1797_v28  ;;  %vm52_vm8 = vcmp.eq.s32.totalorder %v1859_v16, %v1871_v20 }
  0x19   :  { %581 = vxpose.xlu0.b32.cont [2/8] (short) %v544_v60, 128  ;;  %v1473_v5 = vsel %vm452_vm7, 1.0, %v1797_v28  ;;  %v550_v8 = vadd.f32 %v1475_v61, %v404_v63  ;;  %v1380_v9 = vsel %vm52_vm8, 1.0, %v1797_v28  ;;  %vm166_vm9 = vcmp.eq.s32.totalorder %v1859_v16, %v1874_v21 }
  0x1a   :  { %vm312_vm10 = vcmp.eq.s32.totalorder %v1859_v16, %v1877_v22  ;;  %v402_v11 = vadd.f32 %v1440_v2, %v256_v1  ;;  %v1413_v12 = vsel %vm166_vm9, 1.0, %v1797_v28  ;;  %vm458_vm11 = vcmp.eq.s32.totalorder %v1859_v16, %v1880_v23 }
  0x1b   :  { %v1446_v13 = vsel %vm312_vm10, 1.0, %v1797_v28  ;;  %646 = vxpose.xlu1.b32.cont [3/8] (short) %v550_v8, 128  ;;  %v262_v29 = vadd.f32 %v1413_v12, %v1380_v9  ;;  %v1479_v30 = vsel %vm458_vm11, 1.0, %v1797_v28  ;;  %vm50_vm12 = vcmp.eq.s32.totalorder %v1859_v16, %v1883_v24 }
  0x1c   :  { %vm164_vm13 = vcmp.eq.s32.totalorder %v1859_v16, %v1886_v25  ;;  %v548_v31 = vadd.f32 %v1473_v5, %v402_v11  ;;  %v1378_v32 = vsel %vm50_vm12, 1.0, %v1797_v28  ;;  %vm310_vm14 = vcmp.eq.s32.totalorder %v1859_v16, %v1889_v26 }
  0x1d   :  { %v1411_v33 = vsel %vm164_vm13, 1.0, %v1797_v28  ;;  %v408_v34 = vadd.f32 %v1446_v13, %v262_v29  ;;  %v1444_v36 = vsel %vm310_vm14, 1.0, %v1797_v28  ;;  %vm456_vm15 = vcmp.eq.s32.totalorder %v1859_v16, %v1892_v27 }
  0x1e   :  { %v260_v35 = vadd.f32 %v1411_v33, %v1378_v32  ;;  %582 = vxpose.xlu0.b32.cont [3/8] (short) %v548_v31, 128  ;;  %v1477_v37 = vsel %vm456_vm15, 1.0, %v1797_v28  ;;  %vm56_vm0 = vcmp.eq.s32.totalorder %v1862_v17, %v1871_v20  ;;  %vm170_vm1 = vcmp.eq.s32.totalorder %v1862_v17, %v1874_v21  ;;  %v576_v31 = vld [vmem:[%s2426_s1 + $0x20] sm:$0xff]  ;;  %v577_v32 = vld [vmem:[%s2426_s1 + $0x28] sm:$0xff] }
  0x1f   :  { %vm316_vm2 = vcmp.eq.s32.totalorder %v1862_v17, %v1877_v22  ;;  %v554_v38 = vadd.f32 %v1479_v30, %v408_v34  ;;  %v1384_v40 = vsel %vm56_vm0, 1.0, %v1797_v28  ;;  %v1417_v41 = vsel %vm170_vm1, 1.0, %v1797_v28 }
  0x20   :  { %v406_v39 = vadd.f32 %v1444_v36, %v260_v35  ;;  %v266_v42 = vadd.f32 %v1417_v41, %v1384_v40  ;;  %v1450_v43 = vsel %vm316_vm2, 1.0, %v1797_v28  ;;  %vm462_vm3 = vcmp.eq.s32.totalorder %v1862_v17, %v1880_v23 }
  0x21   :  { %vm54_vm4 = vcmp.eq.s32.totalorder %v1862_v17, %v1883_v24  ;;  %647 = vxpose.xlu1.b32.cont [4/8] (short) %v554_v38, 128  ;;  %v1483_v45 = vsel %vm462_vm3, 1.0, %v1797_v28  ;;  %vm168_vm5 = vcmp.eq.s32.totalorder %v1862_v17, %v1886_v25  ;;  %vm314_vm6 = vcmp.eq.s32.totalorder %v1862_v17, %v1889_v26 }
  0x22   :  { %v552_v44 = vadd.f32 %v1477_v37, %v406_v39  ;;  %v1382_v46 = vsel %vm54_vm4, 1.0, %v1797_v28  ;;  %v412_v47 = vadd.f32 %v1450_v43, %v266_v42  ;;  %v1415_v48 = vsel %vm168_vm5, 1.0, %v1797_v28 }
  0x23   :  { %vm460_vm7 = vcmp.eq.s32.totalorder %v1862_v17, %v1892_v27  ;;  %v264_v49 = vadd.f32 %v1415_v48, %v1382_v46  ;;  %v1448_v50 = vsel %vm314_vm6, 1.0, %v1797_v28  ;;  %vm60_vm8 = vcmp.eq.s32.totalorder %v1865_v18, %v1871_v20 }
  0x24   :  { %583 = vxpose.xlu0.b32.cont [4/8] (short) %v552_v44, 128  ;;  %v1481_v51 = vsel %vm460_vm7, 1.0, %v1797_v28  ;;  %v558_v52 = vadd.f32 %v1483_v45, %v412_v47  ;;  %v1388_v53 = vsel %vm60_vm8, 1.0, %v1797_v28  ;;  %vm174_vm9 = vcmp.eq.s32.totalorder %v1865_v18, %v1874_v21 }
  0x25   :  { %vm320_vm10 = vcmp.eq.s32.totalorder %v1865_v18, %v1877_v22  ;;  %v410_v54 = vadd.f32 %v1448_v50, %v264_v49  ;;  %v1421_v55 = vsel %vm174_vm9, 1.0, %v1797_v28  ;;  %vm466_vm11 = vcmp.eq.s32.totalorder %v1865_v18, %v1880_v23 }
  0x26   :  { %v1454_v56 = vsel %vm320_vm10, 1.0, %v1797_v28  ;;  %648 = vxpose.xlu1.b32.cont [5/8] (short) %v558_v52, 128  ;;  %v270_v57 = vadd.f32 %v1421_v55, %v1388_v53  ;;  %v1487_v58 = vsel %vm466_vm11, 1.0, %v1797_v28  ;;  %vm58_vm12 = vcmp.eq.s32.totalorder %v1865_v18, %v1883_v24 }
  0x27   :  { %vm172_vm13 = vcmp.eq.s32.totalorder %v1865_v18, %v1886_v25  ;;  %v556_v59 = vadd.f32 %v1481_v51, %v410_v54  ;;  %v1386_v60 = vsel %vm58_vm12, 1.0, %v1797_v28  ;;  %vm318_vm14 = vcmp.eq.s32.totalorder %v1865_v18, %v1889_v26 }
  0x28   :  { %v1419_v61 = vsel %vm172_vm13, 1.0, %v1797_v28  ;;  %v416_v62 = vadd.f32 %v1454_v56, %v270_v57  ;;  %v1452_v0 = vsel %vm318_vm14, 1.0, %v1797_v28  ;;  %vm464_vm15 = vcmp.eq.s32.totalorder %v1865_v18, %v1892_v27 }
  0x29   :  { %v268_v63 = vadd.f32 %v1419_v61, %v1386_v60  ;;  %584 = vxpose.xlu0.b32.cont [5/8] (short) %v556_v59, 128  ;;  %v1485_v1 = vsel %vm464_vm15, 1.0, %v1797_v28  ;;  %vm64_vm0 = vcmp.eq.s32.totalorder %v1868_v19, %v1871_v20  ;;  %vm178_vm1 = vcmp.eq.s32.totalorder %v1868_v19, %v1874_v21 }
  0x2a   :  { %vm324_vm2 = vcmp.eq.s32.totalorder %v1868_v19, %v1877_v22  ;;  %v562_v2 = vadd.f32 %v1487_v58, %v416_v62  ;;  %v1392_v8 = vsel %vm64_vm0, 1.0, %v1797_v28  ;;  %v1425_v9 = vsel %vm178_vm1, 1.0, %v1797_v28 }
  0x2b   :  { %v414_v5 = vadd.f32 %v1452_v0, %v268_v63  ;;  %v274_v11 = vadd.f32 %v1425_v9, %v1392_v8  ;;  %v1458_v12 = vsel %vm324_vm2, 1.0, %v1797_v28  ;;  %vm470_vm3 = vcmp.eq.s32.totalorder %v1868_v19, %v1880_v23 }
  0x2c   :  { %vm62_vm4 = vcmp.eq.s32.totalorder %v1868_v19, %v1883_v24  ;;  %649 = vxpose.xlu1.b32.cont [6/8] (short) %v562_v2, 128  ;;  %v1491_v29 = vsel %vm470_vm3, 1.0, %v1797_v28  ;;  %vm176_vm5 = vcmp.eq.s32.totalorder %v1868_v19, %v1886_v25  ;;  %vm322_vm6 = vcmp.eq.s32.totalorder %v1868_v19, %v1889_v26 }
  0x2d   :  { %v560_v13 = vadd.f32 %v1485_v1, %v414_v5  ;;  %v1390_v30 = vsel %vm62_vm4, 1.0, %v1797_v28  ;;  %v420_v33 = vadd.f32 %v1458_v12, %v274_v11  ;;  %v1423_v34 = vsel %vm176_vm5, 1.0, %v1797_v28 }
  0x2e   :  { %vm468_vm7 = vcmp.eq.s32.totalorder %v1868_v19, %v1892_v27  ;;  %v272_v35 = vadd.f32 %v1423_v34, %v1390_v30  ;;  %v1456_v36 = vsel %vm322_vm6, 1.0, %v1797_v28  ;;  %v2069_v38 = vadd.s32 56, %v1832_v6 }
  0x2f   :  { %585 = vxpose.xlu0.b32.cont [6/8] (short) %v560_v13, 128  ;;  %v1489_v37 = vsel %vm468_vm7, 1.0, %v1797_v28  ;;  %v566_v39 = vadd.f32 %v1491_v29, %v420_v33  ;;  %v36_v40 = vsub.s32 3, %v1832_v6  ;;  %v28_v41 = vsub.s32 1, %v1832_v6 }
  0x30   :  { %v1753_v42 = vpack.c.bf16 %v577_v32, %v576_v31  ;;  %v418_v43 = vadd.f32 %v1456_v36, %v272_v35  ;;  %vm68_vm8 = vcmp.eq.s32.totalorder %v2069_v38, %v1871_v20  ;;  %vm182_vm9 = vcmp.eq.s32.totalorder %v2069_v38, %v1874_v21 }
  0x31   :  { %vm328_vm10 = vcmp.eq.s32.totalorder %v2069_v38, %v1877_v22  ;;  %650 = vxpose.xlu1.b32.cont [7/8] (short) %v566_v39, 128  ;;  %v1396_v44 = vsel %vm68_vm8, 1.0, %v1797_v28  ;;  %v1429_v45 = vsel %vm182_vm9, 1.0, %v1797_v28  ;;  %vm474_vm11 = vcmp.eq.s32.totalorder %v2069_v38, %v1880_v23 }
  0x32   :  { %v1462_v46 = vsel %vm328_vm10, 1.0, %v1797_v28  ;;  %1754 = vmatprep.subr.bf16.mxu0 %v1753_v42  ;;  %v564_v47 = vadd.f32 %v1489_v37, %v418_v43  ;;  %v278_v48 = vadd.f32 %v1429_v45, %v1396_v44  ;;  %v1495_v20 = vsel %vm474_vm11, 1.0, %v1797_v28  ;;  %1763 = vmatprep.subr.bf16.mxu1 %v1753_v42 }
  0x33   :  { %vm66_vm12 = vcmp.eq.s32.totalorder %v2069_v38, %v1883_v24  ;;  %1756 = vmatpush3.bf16.msra.mxu0 %v1753_v42  ;;  %vm180_vm13 = vcmp.eq.s32.totalorder %v2069_v38, %v1886_v25  ;;  %vm326_vm14 = vcmp.eq.s32.totalorder %v2069_v38, %v1889_v26  ;;  %vm472_vm15 = vcmp.eq.s32.totalorder %v2069_v38, %v1892_v27 }
  0x34   :  { %v1394_v21 = vsel %vm66_vm12, 1.0, %v1797_v28  ;;  %1767 = vmatpush3.bf16.msra.mxu1 %v1753_v42  ;;  %586 = vxpose.xlu0.b32.cont [7/8] (short) %v564_v47, 128  ;;  %v424_v22 = vadd.f32 %v1462_v46, %v278_v48  ;;  %v1427_v23 = vsel %vm180_vm13, 1.0, %v1797_v28  ;;  %v1460_v24 = vsel %vm326_vm14, 1.0, %v1797_v28 }
  0x35   :  { %v1493_v49 = vsel %vm472_vm15, 1.0, %v1797_v28  ;;  %v276_v50 = vadd.f32 %v1427_v23, %v1394_v21  ;;  %v2098_v51 = vrot.slane %v1825_v3, %v36_v40  ;;  %v2101_v25 = vrot.slane %v1830_v4, %v36_v40 }
  0x36   :  { %v2104_v26 = vrot.slane %v1837_v7, %v36_v40  ;;  %v570_v27 = vadd.f32 %v1495_v20, %v424_v22  ;;  %v2107_v52 = vrot.slane %v1848_v10, %v36_v40  ;;  %v2110_v53 = vrot.slane %v1825_v3, %v28_v41 }
  0x37   :  { %v2113_v54 = vrot.slane %v1830_v4, %v28_v41  ;;  %v422_v55 = vadd.f32 %v1460_v24, %v276_v50  ;;  %vm41_vm0 = vcmp.eq.s32.totalorder %v1832_v6, %v2098_v51  ;;  %vm155_vm1 = vcmp.eq.s32.totalorder %v1832_v6, %v2101_v25 }
  0x38   :  { %vm301_vm2 = vcmp.eq.s32.totalorder %v1832_v6, %v2104_v26  ;;  %651 = vxpose.xlu1.b32.end [8/8] (short) %v570_v27, 128  ;;  %v1369_v56 = vsel %vm41_vm0, 1.0, %v1797_v28  ;;  %v1402_v57 = vsel %vm155_vm1, 1.0, %v1797_v28  ;;  %vm447_vm3 = vcmp.eq.s32.totalorder %v1832_v6, %v2107_v52 }
  0x39   :  { %v1435_v3 = vsel %vm301_vm2, 1.0, %v1797_v28  ;;  %v568_v4 = vadd.f32 %v1493_v49, %v422_v55  ;;  %v251_v58 = vadd.f32 %v1402_v57, %v1369_v56  ;;  %v1468_v59 = vsel %vm447_vm3, 1.0, %v1797_v28 }
  0x3a   :  { %vm39_vm4 = vcmp.eq.s32.totalorder %v1832_v6, %v2110_v53  ;;  %vm153_vm5 = vcmp.eq.s32.totalorder %v1832_v6, %v2113_v54  ;;  %v2133_v61 = vrot.slane %v1837_v7, %v28_v41  ;;  %v2136_v62 = vrot.slane %v1848_v10, %v28_v41 }
  0x3b   :  { %v1367_v60 = vsel %vm39_vm4, 1.0, %v1797_v28  ;;  %587 = vxpose.xlu0.b32.end [8/8] (short) %v568_v4, 128  ;;  %v397_v63 = vadd.f32 %v1435_v3, %v251_v58  ;;  %v1400_v0 = vsel %vm153_vm5, 1.0, %v1797_v28  ;;  %vm45_vm6 = vcmp.eq.s32.totalorder %v1853_v14, %v2098_v51 }
  0x3c   :  { %vm159_vm7 = vcmp.eq.s32.totalorder %v1853_v14, %v2101_v25  ;;  %v249_v1 = vadd.f32 %v1400_v0, %v1367_v60  ;;  %vm299_vm8 = vcmp.eq.s32.totalorder %v1832_v6, %v2133_v61  ;;  %vm445_vm9 = vcmp.eq.s32.totalorder %v1832_v6, %v2136_v62 }
  0x3d   :  { %v1373_v7 = vsel %vm45_vm6, 1.0, %v1797_v28  ;;  %v2148_v10 = vadd.f32 %v1468_v59, %v397_v63  ;;  %v1433_v2 = vsel %vm299_vm8, 1.0, %v1797_v28  ;;  %v1466_v5 = vsel %vm445_vm9, 1.0, %v1797_v28 }
  0x3e   :  { %v1406_v8 = vsel %vm159_vm7, 1.0, %v1797_v28  ;;  %v395_v9 = vadd.f32 %v1433_v2, %v249_v1  ;;  %vm305_vm10 = vcmp.eq.s32.totalorder %v1853_v14, %v2104_v26  ;;  %vm451_vm11 = vcmp.eq.s32.totalorder %v1853_v14, %v2107_v52 }
  0x3f   :  { %v255_v11 = vadd.f32 %v1406_v8, %v1373_v7  ;;  %v1439_v6 = vsel %vm305_vm10, 1.0, %v1797_v28  ;;  %v1472_v12 = vsel %vm451_vm11, 1.0, %v1797_v28  ;;  %vm43_vm12 = vcmp.eq.s32.totalorder %v1853_v14, %v2110_v53 }
  0x40   :  { %vm157_vm13 = vcmp.eq.s32.totalorder %v1853_v14, %v2113_v54  ;;  %v2163_v13 = vadd.f32 %v1466_v5, %v395_v9  ;;  %v1371_v30 = vsel %vm43_vm12, 1.0, %v1797_v28  ;;  %vm303_vm14 = vcmp.eq.s32.totalorder %v1853_v14, %v2133_v61 }
  0x41   :  { %v401_v29 = vadd.f32 %v1439_v6, %v255_v11  ;;  %v1404_v31 = vsel %vm157_vm13, 1.0, %v1797_v28  ;;  %vm449_vm15 = vcmp.eq.s32.totalorder %v1853_v14, %v2136_v62  ;;  %vm49_vm0 = vcmp.eq.s32.totalorder %v1856_v15, %v2098_v51 }
  0x42   :  { %v253_v32 = vadd.f32 %v1404_v31, %v1371_v30  ;;  %v1437_v34 = vsel %vm303_vm14, 1.0, %v1797_v28  ;;  %v1470_v35 = vsel %vm449_vm15, 1.0, %v1797_v28  ;;  %v1377_v36 = vsel %vm49_vm0, 1.0, %v1797_v28 }
  0x43   :  { %v2173_v33 = vadd.f32 %v1472_v12, %v401_v29  ;;  %vm163_vm1 = vcmp.eq.s32.totalorder %v1856_v15, %v2101_v25  ;;  %vm309_vm2 = vcmp.eq.s32.totalorder %v1856_v15, %v2104_v26  ;;  %vm455_vm3 = vcmp.eq.s32.totalorder %v1856_v15, %v2107_v52 }
  0x44   :  { %v399_v37 = vadd.f32 %v1437_v34, %v253_v32  ;;  %v1410_v14 = vsel %vm163_vm1, 1.0, %v1797_v28  ;;  %v1443_v39 = vsel %vm309_vm2, 1.0, %v1797_v28  ;;  %v1476_v40 = vsel %vm455_vm3, 1.0, %v1797_v28 }
  0x45   :  { %vm47_vm4 = vcmp.eq.s32.totalorder %v1856_v15, %v2110_v53  ;;  %v259_v42 = vadd.f32 %v1410_v14, %v1377_v36  ;;  %vm161_vm5 = vcmp.eq.s32.totalorder %v1856_v15, %v2113_v54  ;;  %vm307_vm6 = vcmp.eq.s32.totalorder %v1856_v15, %v2133_v61 }
  0x46   :  { %v2189_v41 = vadd.f32 %v1470_v35, %v399_v37  ;;  %v1375_v43 = vsel %vm47_vm4, 1.0, %v1797_v28  ;;  %v1408_v44 = vsel %vm161_vm5, 1.0, %v1797_v28  ;;  %vm453_vm7 = vcmp.eq.s32.totalorder %v1856_v15, %v2136_v62 }
  0x47   :  { %vm53_vm8 = vcmp.eq.s32.totalorder %v1859_v16, %v2098_v51  ;;  %v405_v45 = vadd.f32 %v1443_v39, %v259_v42  ;;  %v257_v46 = vadd.f32 %v1408_v44, %v1375_v43  ;;  %v1441_v47 = vsel %vm307_vm6, 1.0, %v1797_v28 }
  0x48   :  { %v1474_v48 = vsel %vm453_vm7, 1.0, %v1797_v28  ;;  %v1381_v20 = vsel %vm53_vm8, 1.0, %v1797_v28  ;;  %vm167_vm9 = vcmp.eq.s32.totalorder %v1859_v16, %v2101_v25  ;;  %vm313_vm10 = vcmp.eq.s32.totalorder %v1859_v16, %v2104_v26 }
  0x49   :  { %vm459_vm11 = vcmp.eq.s32.totalorder %v1859_v16, %v2107_v52  ;;  %v2210_v15 = vadd.f32 %v1476_v40, %v405_v45  ;;  %v403_v21 = vadd.f32 %v1441_v47, %v257_v46  ;;  %v1414_v22 = vsel %vm167_vm9, 1.0, %v1797_v28 }
  0x4a   :  { %v1447_v23 = vsel %vm313_vm10, 1.0, %v1797_v28  ;;  %v263_v24 = vadd.f32 %v1414_v22, %v1381_v20  ;;  %v1480_v49 = vsel %vm459_vm11, 1.0, %v1797_v28  ;;  %vm51_vm12 = vcmp.eq.s32.totalorder %v1859_v16, %v2110_v53 }
  0x4b   :  { %vm165_vm13 = vcmp.eq.s32.totalorder %v1859_v16, %v2113_v54  ;;  %v2219_v50 = vadd.f32 %v1474_v48, %v403_v21  ;;  %v1379_v27 = vsel %vm51_vm12, 1.0, %v1797_v28  ;;  %vm311_vm14 = vcmp.eq.s32.totalorder %v1859_v16, %v2133_v61 }
  0x4c   :  { %v1412_v55 = vsel %vm165_vm13, 1.0, %v1797_v28  ;;  %v409_v56 = vadd.f32 %v1447_v23, %v263_v24  ;;  %v1445_v3 = vsel %vm311_vm14, 1.0, %v1797_v28  ;;  %vm457_vm15 = vcmp.eq.s32.totalorder %v1859_v16, %v2136_v62 }
  0x4d   :  { %v261_v57 = vadd.f32 %v1412_v55, %v1379_v27  ;;  %v1478_v4 = vsel %vm457_vm15, 1.0, %v1797_v28  ;;  %vm57_vm0 = vcmp.eq.s32.totalorder %v1862_v17, %v2098_v51  ;;  %vm171_vm1 = vcmp.eq.s32.totalorder %v1862_v17, %v2101_v25 }
  0x4e   :  { %vm317_vm2 = vcmp.eq.s32.totalorder %v1862_v17, %v2104_v26  ;;  %v2235_v58 = vadd.f32 %v1480_v49, %v409_v56  ;;  %v1385_v60 = vsel %vm57_vm0, 1.0, %v1797_v28  ;;  %v1418_v63 = vsel %vm171_vm1, 1.0, %v1797_v28 }
  0x4f   :  { %v407_v59 = vadd.f32 %v1445_v3, %v261_v57  ;;  %v267_v0 = vadd.f32 %v1418_v63, %v1385_v60  ;;  %v1451_v16 = vsel %vm317_vm2, 1.0, %v1797_v28  ;;  %vm463_vm3 = vcmp.eq.s32.totalorder %v1862_v17, %v2107_v52 }
  0x50   :  { %vm55_vm4 = vcmp.eq.s32.totalorder %v1862_v17, %v2110_v53  ;;  %v1484_v7 = vsel %vm463_vm3, 1.0, %v1797_v28  ;;  %vm169_vm5 = vcmp.eq.s32.totalorder %v1862_v17, %v2113_v54  ;;  %vm315_vm6 = vcmp.eq.s32.totalorder %v1862_v17, %v2133_v61 }
  0x51   :  { %v2244_v1 = vadd.f32 %v1478_v4, %v407_v59  ;;  %v1383_v2 = vsel %vm55_vm4, 1.0, %v1797_v28  ;;  %v413_v5 = vadd.f32 %v1451_v16, %v267_v0  ;;  %v1416_v8 = vsel %vm169_vm5, 1.0, %v1797_v28 }
  0x52   :  { %vm461_vm7 = vcmp.eq.s32.totalorder %v1862_v17, %v2136_v62  ;;  %v265_v9 = vadd.f32 %v1416_v8, %v1383_v2  ;;  %v1449_v11 = vsel %vm315_vm6, 1.0, %v1797_v28  ;;  %vm61_vm8 = vcmp.eq.s32.totalorder %v1865_v18, %v2098_v51 }
  0x53   :  { %v1482_v6 = vsel %vm461_vm7, 1.0, %v1797_v28  ;;  %v2259_v12 = vadd.f32 %v1484_v7, %v413_v5  ;;  %v1389_v29 = vsel %vm61_vm8, 1.0, %v1797_v28  ;;  %vm175_vm9 = vcmp.eq.s32.totalorder %v1865_v18, %v2101_v25 }
  0x54   :  { %vm321_vm10 = vcmp.eq.s32.totalorder %v1865_v18, %v2104_v26  ;;  %v411_v30 = vadd.f32 %v1449_v11, %v265_v9  ;;  %v1422_v17 = vsel %vm175_vm9, 1.0, %v1797_v28  ;;  %vm467_vm11 = vcmp.eq.s32.totalorder %v1865_v18, %v2107_v52 }
  0x55   :  { %v1455_v31 = vsel %vm321_vm10, 1.0, %v1797_v28  ;;  %v271_v32 = vadd.f32 %v1422_v17, %v1389_v29  ;;  %v1488_v34 = vsel %vm467_vm11, 1.0, %v1797_v28  ;;  %vm59_vm12 = vcmp.eq.s32.totalorder %v1865_v18, %v2110_v53 }
  0x56   :  { %vm173_vm13 = vcmp.eq.s32.totalorder %v1865_v18, %v2113_v54  ;;  %v2275_v35 = vadd.f32 %v1482_v6, %v411_v30  ;;  %v1387_v36 = vsel %vm59_vm12, 1.0, %v1797_v28  ;;  %vm319_vm14 = vcmp.eq.s32.totalorder %v1865_v18, %v2133_v61 }
  0x57   :  { %v1420_v37 = vsel %vm173_vm13, 1.0, %v1797_v28  ;;  %v417_v14 = vadd.f32 %v1455_v31, %v271_v32  ;;  %v1453_v40 = vsel %vm319_vm14, 1.0, %v1797_v28  ;;  %vm465_vm15 = vcmp.eq.s32.totalorder %v1865_v18, %v2136_v62 }
  0x58   :  { %v269_v39 = vadd.f32 %v1420_v37, %v1387_v36  ;;  %v1486_v42 = vsel %vm465_vm15, 1.0, %v1797_v28  ;;  %vm65_vm0 = vcmp.eq.s32.totalorder %v1868_v19, %v2098_v51  ;;  %vm179_vm1 = vcmp.eq.s32.totalorder %v1868_v19, %v2101_v25 }
  0x59   :  { %vm325_vm2 = vcmp.eq.s32.totalorder %v1868_v19, %v2104_v26  ;;  %676 = vxpose.xlu1.b32.start [1/8] (short) %v2148_v10, 128  ;;  %v563_v43 = vadd.f32 %v1488_v34, %v417_v14  ;;  %v1393_v45 = vsel %vm65_vm0, 1.0, %v1797_v28  ;;  %v1426_v46 = vsel %vm179_vm1, 1.0, %v1797_v28 }
  0x5a   :  { %v415_v44 = vadd.f32 %v1453_v40, %v269_v39  ;;  %v275_v18 = vadd.f32 %v1426_v46, %v1393_v45  ;;  %v1459_v47 = vsel %vm325_vm2, 1.0, %v1797_v28  ;;  %vm471_vm3 = vcmp.eq.s32.totalorder %v1868_v19, %v2107_v52 }
  0x5b   :  { %vm63_vm4 = vcmp.eq.s32.totalorder %v1868_v19, %v2110_v53  ;;  %v1492_v20 = vsel %vm471_vm3, 1.0, %v1797_v28  ;;  %vm177_vm5 = vcmp.eq.s32.totalorder %v1868_v19, %v2113_v54  ;;  %vm323_vm6 = vcmp.eq.s32.totalorder %v1868_v19, %v2133_v61 }
  0x5c   :  { %v561_v48 = vadd.f32 %v1486_v42, %v415_v44  ;;  %v1391_v10 = vsel %vm63_vm4, 1.0, %v1797_v28  ;;  %612 = vxpose.xlu0.b32.start [1/8] (short) %v2163_v13, 128  ;;  %v421_v21 = vadd.f32 %v1459_v47, %v275_v18  ;;  %v1424_v22 = vsel %vm177_vm5, 1.0, %v1797_v28 }
  0x5d   :  { %vm469_vm7 = vcmp.eq.s32.totalorder %v1868_v19, %v2136_v62  ;;  %677 = vxpose.xlu1.b32.cont [2/8] (short) %v2173_v33, 128  ;;  %v273_v23 = vadd.f32 %v1424_v22, %v1391_v10  ;;  %v1457_v24 = vsel %vm323_vm6, 1.0, %v1797_v28  ;;  %vm69_vm8 = vcmp.eq.s32.totalorder %v2069_v38, %v2098_v51 }
  0x5e   :  { %v1490_v49 = vsel %vm469_vm7, 1.0, %v1797_v28  ;;  %v567_v13 = vadd.f32 %v1492_v20, %v421_v21  ;;  %v1397_v27 = vsel %vm69_vm8, 1.0, %v1797_v28  ;;  %vm183_vm9 = vcmp.eq.s32.totalorder %v2069_v38, %v2101_v25  ;;  %v578_v25 = vld [vmem:[%s2426_s1 + $0x30] sm:$0xff] }
  0x5f   :  { %vm329_vm10 = vcmp.eq.s32.totalorder %v2069_v38, %v2104_v26  ;;  %v419_v19 = vadd.f32 %v1457_v24, %v273_v23  ;;  %v1430_v33 = vsel %vm183_vm9, 1.0, %v1797_v28  ;;  %vm475_vm11 = vcmp.eq.s32.totalorder %v2069_v38, %v2107_v52  ;;  %v579_v26 = vld [vmem:[%s2426_s1 + $0x38] sm:$0xff]  ;;  %s1798_s1 = smov [#allocation2]  }
  0x60   :  { %v1463_v55 = vsel %vm329_vm10, 1.0, %v1797_v28  ;;  %613 = vxpose.xlu0.b32.cont [2/8] (short) %v2189_v41, 128  ;;  %v279_v51 = vadd.f32 %v1430_v33, %v1397_v27  ;;  %v1496_v56 = vsel %vm475_vm11, 1.0, %v1797_v28  ;;  %vm67_vm12 = vcmp.eq.s32.totalorder %v2069_v38, %v2110_v53  ;;  %s1355_s4 = sshll.u32 %s1798_s1, 4  ;;  %s1356_s4 = int_to_ptr.vmem [resolvable:$true] %s1355_s4 }
  0x61   :  { %vm181_vm13 = vcmp.eq.s32.totalorder %v2069_v38, %v2113_v54  ;;  %678 = vxpose.xlu1.b32.cont [3/8] (short) %v2210_v15, 128  ;;  %v565_v52 = vadd.f32 %v1490_v49, %v419_v19  ;;  %v1395_v41 = vsel %vm67_vm12, 1.0, %v1797_v28  ;;  %vm327_vm14 = vcmp.eq.s32.totalorder %v2069_v38, %v2133_v61  ;;  %s1773_s5 = scalar_lea.vmem %s1356_s4, 8192  ;;  %p1778_p1 = scmp.lt.s32.totalorder %s1356_s4, %s1356_s4 }
  0x62   :  { %v1428_v57 = vsel %vm181_vm13, 1.0, %v1797_v28  ;;  %v425_v53 = vadd.f32 %v1463_v55, %v279_v51  ;;  %v1461_v3 = vsel %vm327_vm14, 1.0, %v1797_v28  ;;  %vm473_vm15 = vcmp.eq.s32.totalorder %v2069_v38, %v2136_v62  ;;  %p1774_p0 = scmp.ne.s32.totalorder %s1356_s4, %s1773_s5  ;;  %p1779_p2 = scmp.lt.s32.totalorder %s1773_s5, %s1773_s5 }
  0x63   :  { %v277_v54 = vadd.f32 %v1428_v57, %v1395_v41  ;;  %v1494_v4 = vsel %vm473_vm15, 1.0, %v1797_v28  ;;  %v1757_v59 = vpack.c.bf16 %v579_v26, %v578_v25  ;;  %vm708_vm0 = vcmask 523264  }
  0x64   :  { %614 = vxpose.xlu0.b32.cont [3/8] (short) %v2219_v50, 128  ;;  %v571_v15 = vadd.f32 %v1496_v56, %v425_v53  ;;  %p1780_p3 = por %p1779_p2, %p1778_p1 }
  0x65   :  { %v423_v60 = vadd.f32 %v1461_v3, %v277_v54  ;;  %679 = vxpose.xlu1.b32.cont [4/8] (short) %v2235_v58, 128  ;;  %1758 = vmatprep.subr.bf16.mxu0 %v1757_v59 }
  0x66   :  { %1764 = vmatprep.subr.bf16.mxu1 %v1757_v59  ;;  %1760 = vmatpush3.bf16.msra.mxu0 %v1757_v59  ;;  %p1781_p4 = pnand %p1780_p3, %p1774_p0 }
  0x67   :  { %v569_v63 = vadd.f32 %v1494_v4, %v423_v60  ;;  %1768 = vmatpush3.bf16.msra.mxu1 %v1757_v59 }
  0x68   :  { %615 = vxpose.xlu0.b32.cont [4/8] (short) %v2244_v1, 128 }
  0x69   :  { %680 = vxpose.xlu1.b32.cont [5/8] (short) %v2259_v12, 128 }
  0x6c   :  { %616 = vxpose.xlu0.b32.cont [5/8] (short) %v2275_v35, 128 }
  0x6d   :  { %681 = vxpose.xlu1.b32.cont [6/8] (short) %v563_v43, 128 }
  0x70   :  { %617 = vxpose.xlu0.b32.cont [6/8] (short) %v561_v48, 128 }
  0x71   :  { %682 = vxpose.xlu1.b32.cont [7/8] (short) %v567_v13, 128 }
  0x74   :  { %618 = vxpose.xlu0.b32.cont [7/8] (short) %v565_v52, 128 }
  0x75   :  { %683 = vxpose.xlu1.b32.end [8/8] (short) %v571_v15, 128 }
  0x78   :  { %619 = vxpose.xlu0.b32.end [8/8] (short) %v569_v63, 128 }
  0x9c   :  { %v660_v28 = vpop.trf.xlu1 }
  0x9d   :  { %1697 = vmatprep.mubr.msk.f32.mxu1 %vm708_vm0, %v660_v28 }
  0x9f   :  { %v596_v38 = vpop.trf.xlu0 }
  0xa0   :  { %1649 = vmatprep.mubr.msk.f32.mxu0 %vm708_vm0, %v596_v38  ;;  %v661_v61 = vpop.trf.xlu1 }
  0xa1   :  { %1698 = vmatmul.mubr.msk.f32.vlgmr.msra.gmra.mrb[0].mxu1 %vm708_vm0, %v661_v61 }
  0xa3   :  { %v597_v62 = vpop.trf.xlu0 }
  0xa4   :  { %1650 = vmatmul.mubr.msk.f32.vlgmr.msra.gmra.mrb[0].mxu0 %vm708_vm0, %v597_v62  ;;  %v662_v50 = vpop.trf.xlu1 }
  0xa5   :  { %1700 = vmatprep.mubr.msk.f32.mxu1 %vm708_vm0, %v662_v50 }
  0xa7   :  { %v598_v58 = vpop.trf.xlu0 }
  0xa8   :  { %1652 = vmatprep.mubr.msk.f32.mxu0 %vm708_vm0, %v598_v58  ;;  %v663_v0 = vpop.trf.xlu1 }
  0xa9   :  { %1701 = vmatmul.mubr.msk.f32.gmra.mrb[2].mxu1 %vm708_vm0, %v663_v0 }
  0xab   :  { %v599_v16 = vpop.trf.xlu0 }
  0xac   :  { %1653 = vmatmul.mubr.msk.f32.gmra.mrb[2].mxu0 %vm708_vm0, %v599_v16  ;;  %v664_v1 = vpop.trf.xlu1 }
  0xad   :  { %1703 = vmatprep.mubr.msk.f32.mxu1 %vm708_vm0, %v664_v1 }
  0xaf   :  { %v600_v7 = vpop.trf.xlu0 }
  0xb0   :  { %1655 = vmatprep.mubr.msk.f32.mxu0 %vm708_vm0, %v600_v7  ;;  %v665_v2 = vpop.trf.xlu1 }
  0xb1   :  { %1704 = vmatmul.mubr.msk.f32.gmra.mrb[4].mxu1 %vm708_vm0, %v665_v2 }
  0xb3   :  { %v601_v5 = vpop.trf.xlu0 }
  0xb4   :  { %1656 = vmatmul.mubr.msk.f32.gmra.mrb[4].mxu0 %vm708_vm0, %v601_v5  ;;  %v666_v8 = vpop.trf.xlu1 }
  0xb5   :  { %1706 = vmatprep.mubr.msk.f32.mxu1 %vm708_vm0, %v666_v8 }
  0xb7   :  { %v602_v9 = vpop.trf.xlu0 }
  0xb8   :  { %1658 = vmatprep.mubr.msk.f32.mxu0 %vm708_vm0, %v602_v9  ;;  %v667_v11 = vpop.trf.xlu1 }
  0xb9   :  { %1707 = vmatmul.mubr.msk.f32.gmra.mrb[6].mxu1 %vm708_vm0, %v667_v11 }
  0xbb   :  { %v603_v6 = vpop.trf.xlu0 }
  0xbc   :  { %1659 = vmatmul.mubr.msk.f32.gmra.mrb[6].mxu0 %vm708_vm0, %v603_v6  ;;  %v668_v12 = vpop.trf.xlu1 }
  0xbd   :  { %1709 = vmatprep.mubr.msk.f32.mxu1 %vm708_vm0, %v668_v12 }
  0xbf   :  { %v604_v29 = vpop.trf.xlu0 }
  0xc0   :  { %1661 = vmatprep.mubr.msk.f32.mxu0 %vm708_vm0, %v604_v29  ;;  %v669_v30 = vpop.trf.xlu1 }
  0xc1   :  { %1710 = vmatmul.mubr.msk.f32.gmra.mrb[8].mxu1 %vm708_vm0, %v669_v30 }
  0xc3   :  { %v605_v17 = vpop.trf.xlu0 }
  0xc4   :  { %1662 = vmatmul.mubr.msk.f32.gmra.mrb[8].mxu0 %vm708_vm0, %v605_v17  ;;  %v670_v31 = vpop.trf.xlu1 }
  0xc5   :  { %1712 = vmatprep.mubr.msk.f32.mxu1 %vm708_vm0, %v670_v31 }
  0xc7   :  { %v606_v32 = vpop.trf.xlu0 }
  0xc8   :  { %1664 = vmatprep.mubr.msk.f32.mxu0 %vm708_vm0, %v606_v32  ;;  %v671_v34 = vpop.trf.xlu1 }
  0xc9   :  { %1713 = vmatmul.mubr.msk.f32.gmra.mrb[10].mxu1 %vm708_vm0, %v671_v34 }
  0xcb   :  { %v607_v35 = vpop.trf.xlu0 }
  0xcc   :  { %1665 = vmatmul.mubr.msk.f32.gmra.mrb[10].mxu0 %vm708_vm0, %v607_v35  ;;  %v672_v36 = vpop.trf.xlu1 }
  0xcd   :  { %1715 = vmatprep.mubr.msk.f32.mxu1 %vm708_vm0, %v672_v36 }
  0xcf   :  { %v608_v37 = vpop.trf.xlu0 }
  0xd0   :  { %1667 = vmatprep.mubr.msk.f32.mxu0 %vm708_vm0, %v608_v37  ;;  %v673_v14 = vpop.trf.xlu1 }
  0xd1   :  { %1716 = vmatmul.mubr.msk.f32.gmra.mrb[12].mxu1 %vm708_vm0, %v673_v14 }
  0xd3   :  { %v609_v39 = vpop.trf.xlu0 }
  0xd4   :  { %1668 = vmatmul.mubr.msk.f32.gmra.mrb[12].mxu0 %vm708_vm0, %v609_v39  ;;  %v674_v40 = vpop.trf.xlu1 }
  0xd5   :  { %1718 = vmatprep.mubr.msk.f32.mxu1 %vm708_vm0, %v674_v40 }
  0xd7   :  { %v610_v42 = vpop.trf.xlu0 }
  0xd8   :  { %1670 = vmatprep.mubr.msk.f32.mxu0 %vm708_vm0, %v610_v42  ;;  %v675_v43 = vpop.trf.xlu1 }
  0xd9   :  { %1719 = vmatmul.mubr.msk.f32.gmra.mrb[14].mxu1 %vm708_vm0, %v675_v43 }
  0xdb   :  { %v611_v44 = vpop.trf.xlu0 }
  0xdc   :  { %1671 = vmatmul.mubr.msk.f32.gmra.mrb[14].mxu0 %vm708_vm0, %v611_v44  ;;  %v692_v45 = vpop.trf.xlu1 }
  0xdd   :  { %1721 = vmatprep.mubr.msk.f32.mxu1 %vm708_vm0, %v692_v45 }
  0xdf   :  { %v628_v46 = vpop.trf.xlu0 }
  0xe0   :  { %1673 = vmatprep.mubr.msk.f32.mxu0 %vm708_vm0, %v628_v46  ;;  %v693_v18 = vpop.trf.xlu1 }
  0xe1   :  { %1722 = vmatmul.mubr.msk.f32.gmra.mrb[16].mxu1 %vm708_vm0, %v693_v18 }
  0xe3   :  { %v629_v47 = vpop.trf.xlu0 }
  0xe4   :  { %1674 = vmatmul.mubr.msk.f32.gmra.mrb[16].mxu0 %vm708_vm0, %v629_v47  ;;  %v694_v48 = vpop.trf.xlu1 }
  0xe5   :  { %1724 = vmatprep.mubr.msk.f32.mxu1 %vm708_vm0, %v694_v48 }
  0xe7   :  { %v630_v20 = vpop.trf.xlu0 }
  0xe8   :  { %1676 = vmatprep.mubr.msk.f32.mxu0 %vm708_vm0, %v630_v20  ;;  %v695_v10 = vpop.trf.xlu1 }
  0xe9   :  { %1725 = vmatmul.mubr.msk.f32.gmra.mrb[18].mxu1 %vm708_vm0, %v695_v10 }
  0xeb   :  { %v631_v21 = vpop.trf.xlu0 }
  0xec   :  { %1677 = vmatmul.mubr.msk.f32.gmra.mrb[18].mxu0 %vm708_vm0, %v631_v21  ;;  %v696_v22 = vpop.trf.xlu1 }
  0xed   :  { %1727 = vmatprep.mubr.msk.f32.mxu1 %vm708_vm0, %v696_v22 }
  0xef   :  { %v632_v23 = vpop.trf.xlu0 }
  0xf0   :  { %1679 = vmatprep.mubr.msk.f32.mxu0 %vm708_vm0, %v632_v23  ;;  %v697_v24 = vpop.trf.xlu1 }
  0xf1   :  { %1728 = vmatmul.mubr.msk.f32.gmra.mrb[20].mxu1 %vm708_vm0, %v697_v24 }
  0xf3   :  { %v633_v49 = vpop.trf.xlu0 }
  0xf4   :  { %1680 = vmatmul.mubr.msk.f32.gmra.mrb[20].mxu0 %vm708_vm0, %v633_v49  ;;  %v698_v13 = vpop.trf.xlu1 }
  0xf5   :  { %1730 = vmatprep.mubr.msk.f32.mxu1 %vm708_vm0, %v698_v13 }
  0xf7   :  { %v634_v27 = vpop.trf.xlu0 }
  0xf8   :  { %1682 = vmatprep.mubr.msk.f32.mxu0 %vm708_vm0, %v634_v27  ;;  %v699_v19 = vpop.trf.xlu1 }
  0xf9   :  { %1731 = vmatmul.mubr.msk.f32.gmra.mrb[22].mxu1 %vm708_vm0, %v699_v19 }
  0xfb   :  { %v635_v33 = vpop.trf.xlu0 }
  0xfc   :  { %1683 = vmatmul.mubr.msk.f32.gmra.mrb[22].mxu0 %vm708_vm0, %v635_v33  ;;  %v700_v55 = vpop.trf.xlu1 }
  0xfd   :  { %1733 = vmatprep.mubr.msk.f32.mxu1 %vm708_vm0, %v700_v55 }
  0xff   :  { %v636_v51 = vpop.trf.xlu0 }
 0x100   :  { %1685 = vmatprep.mubr.msk.f32.mxu0 %vm708_vm0, %v636_v51  ;;  %v701_v56 = vpop.trf.xlu1 }
 0x101   :  { %1734 = vmatmul.mubr.msk.f32.gmra.mrb[24].mxu1 %vm708_vm0, %v701_v56 }
 0x103   :  { %v637_v25 = vpop.trf.xlu0 }
 0x104   :  { %1686 = vmatmul.mubr.msk.f32.gmra.mrb[24].mxu0 %vm708_vm0, %v637_v25  ;;  %v702_v26 = vpop.trf.xlu1 }
 0x105   :  { %1736 = vmatprep.mubr.msk.f32.mxu1 %vm708_vm0, %v702_v26 }
 0x107   :  { %v638_v52 = vpop.trf.xlu0 }
 0x108   :  { %1688 = vmatprep.mubr.msk.f32.mxu0 %vm708_vm0, %v638_v52  ;;  %v703_v41 = vpop.trf.xlu1 }
 0x109   :  { %1737 = vmatmul.mubr.msk.f32.gmra.mrb[26].mxu1 %vm708_vm0, %v703_v41 }
 0x10b   :  { %v639_v57 = vpop.trf.xlu0 }
 0x10c   :  { %1689 = vmatmul.mubr.msk.f32.gmra.mrb[26].mxu0 %vm708_vm0, %v639_v57  ;;  %v704_v53 = vpop.trf.xlu1 }
 0x10d   :  { %1739 = vmatprep.mubr.msk.f32.mxu1 %vm708_vm0, %v704_v53 }
 0x10f   :  { %v640_v54 = vpop.trf.xlu0 }
 0x110   :  { %1691 = vmatprep.mubr.msk.f32.mxu0 %vm708_vm0, %v640_v54  ;;  %v705_v3 = vpop.trf.xlu1 }
 0x111   :  { %1740 = vmatmul.mubr.msk.f32.gmra.mrb[28].mxu1 %vm708_vm0, %v705_v3 }
 0x113   :  { %v641_v4 = vpop.trf.xlu0 }
 0x114   :  { %1692 = vmatmul.mubr.msk.f32.gmra.mrb[28].mxu0 %vm708_vm0, %v641_v4  ;;  %v706_v59 = vpop.trf.xlu1 }
 0x115   :  { %1742 = vmatprep.mubr.msk.f32.mxu1 %vm708_vm0, %v706_v59 }
 0x117   :  { %v642_v15 = vpop.trf.xlu0 }
 0x118   :  { %1694 = vmatprep.mubr.msk.f32.mxu0 %vm708_vm0, %v642_v15  ;;  %v707_v60 = vpop.trf.xlu1 }
 0x119   :  { %1743 = vmatmul.mubr.msk.f32.gmra.mrb[30].mxu1 %vm708_vm0, %v707_v60 }
 0x11b   :  { %v643_v63 = vpop.trf.xlu0 }
 0x11c   :  { %1695 = vmatmul.mubr.msk.f32.gmra.mrb[30].mxu0 %vm708_vm0, %v643_v63 }
 0x174   :  { %v1699_v28 = vpop.f32.mrb[0].mxu1 }
 0x175   :  { %1319 = vst [vmem:[#allocation2 + $0x108] sm:$0xff] %v1699_v28  ;;  %v1127_v38 = vpop.f32.mrb[1].mxu1 }
 0x176   :  { %1318 = vst [vmem:[#allocation2 + $0x100] sm:$0xff] %v1127_v38 }
 0x177   :  { %v1651_v61 = vpop.f32.mrb[0].mxu0 }
 0x178   :  { %1287 = vst [vmem:[#allocation2 + $0x8] sm:$0xff] %v1651_v61  ;;  %v967_v62 = vpop.f32.mrb[1].mxu0 }
 0x179   :  { %1286 = vst [vmem:[#allocation2] sm:$0xff] %v967_v62 }
 0x17c   :  { %v1702_v50 = vpop.f32.mrb[2].mxu1 }
 0x17d   :  { %1321 = vst [vmem:[#allocation2 + $0x118] sm:$0xff] %v1702_v50  ;;  %v1137_v58 = vpop.f32.mrb[3].mxu1 }
 0x17e   :  { %1320 = vst [vmem:[#allocation2 + $0x110] sm:$0xff] %v1137_v58 }
 0x17f   :  { %v1654_v0 = vpop.f32.mrb[2].mxu0 }
 0x180   :  { %1289 = vst [vmem:[#allocation2 + $0x18] sm:$0xff] %v1654_v0  ;;  %v977_v16 = vpop.f32.mrb[3].mxu0 }
 0x181   :  { %1288 = vst [vmem:[#allocation2 + $0x10] sm:$0xff] %v977_v16 }
 0x184   :  { %v1705_v1 = vpop.f32.mrb[4].mxu1 }
 0x185   :  { %1323 = vst [vmem:[#allocation2 + $0x128] sm:$0xff] %v1705_v1  ;;  %v1147_v7 = vpop.f32.mrb[5].mxu1 }
 0x186   :  { %1322 = vst [vmem:[#allocation2 + $0x120] sm:$0xff] %v1147_v7 }
 0x187   :  { %v1657_v2 = vpop.f32.mrb[4].mxu0 }
 0x188   :  { %1291 = vst [vmem:[#allocation2 + $0x28] sm:$0xff] %v1657_v2  ;;  %v987_v5 = vpop.f32.mrb[5].mxu0 }
 0x189   :  { %1290 = vst [vmem:[#allocation2 + $0x20] sm:$0xff] %v987_v5 }
 0x18c   :  { %v1708_v8 = vpop.f32.mrb[6].mxu1 }
 0x18d   :  { %1325 = vst [vmem:[#allocation2 + $0x138] sm:$0xff] %v1708_v8  ;;  %v1157_v9 = vpop.f32.mrb[7].mxu1 }
 0x18e   :  { %1324 = vst [vmem:[#allocation2 + $0x130] sm:$0xff] %v1157_v9 }
 0x18f   :  { %v1660_v11 = vpop.f32.mrb[6].mxu0 }
 0x190   :  { %1293 = vst [vmem:[#allocation2 + $0x38] sm:$0xff] %v1660_v11  ;;  %v997_v6 = vpop.f32.mrb[7].mxu0 }
 0x191   :  { %1292 = vst [vmem:[#allocation2 + $0x30] sm:$0xff] %v997_v6 }
 0x194   :  { %v1711_v12 = vpop.f32.mrb[8].mxu1 }
 0x195   :  { %1327 = vst [vmem:[#allocation2 + $0x148] sm:$0xff] %v1711_v12  ;;  %v1167_v29 = vpop.f32.mrb[9].mxu1 }
 0x196   :  { %1326 = vst [vmem:[#allocation2 + $0x140] sm:$0xff] %v1167_v29 }
 0x197   :  { %v1663_v30 = vpop.f32.mrb[8].mxu0 }
 0x198   :  { %1295 = vst [vmem:[#allocation2 + $0x48] sm:$0xff] %v1663_v30  ;;  %v1007_v17 = vpop.f32.mrb[9].mxu0 }
 0x199   :  { %1294 = vst [vmem:[#allocation2 + $0x40] sm:$0xff] %v1007_v17 }
 0x19c   :  { %v1714_v31 = vpop.f32.mrb[10].mxu1 }
 0x19d   :  { %1329 = vst [vmem:[#allocation2 + $0x158] sm:$0xff] %v1714_v31  ;;  %v1177_v32 = vpop.f32.mrb[11].mxu1 }
 0x19e   :  { %1328 = vst [vmem:[#allocation2 + $0x150] sm:$0xff] %v1177_v32 }
 0x19f   :  { %v1666_v34 = vpop.f32.mrb[10].mxu0 }
 0x1a0   :  { %1297 = vst [vmem:[#allocation2 + $0x58] sm:$0xff] %v1666_v34  ;;  %v1017_v35 = vpop.f32.mrb[11].mxu0 }
 0x1a1   :  { %1296 = vst [vmem:[#allocation2 + $0x50] sm:$0xff] %v1017_v35 }
 0x1a4   :  { %v1717_v36 = vpop.f32.mrb[12].mxu1 }
 0x1a5   :  { %1331 = vst [vmem:[#allocation2 + $0x168] sm:$0xff] %v1717_v36  ;;  %v1187_v37 = vpop.f32.mrb[13].mxu1 }
 0x1a6   :  { %1330 = vst [vmem:[#allocation2 + $0x160] sm:$0xff] %v1187_v37 }
 0x1a7   :  { %v1669_v14 = vpop.f32.mrb[12].mxu0 }
 0x1a8   :  { %1299 = vst [vmem:[#allocation2 + $0x68] sm:$0xff] %v1669_v14  ;;  %v1027_v39 = vpop.f32.mrb[13].mxu0 }
 0x1a9   :  { %1298 = vst [vmem:[#allocation2 + $0x60] sm:$0xff] %v1027_v39 }
 0x1ac   :  { %v1720_v40 = vpop.f32.mrb[14].mxu1 }
 0x1ad   :  { %1333 = vst [vmem:[#allocation2 + $0x178] sm:$0xff] %v1720_v40  ;;  %v1197_v42 = vpop.f32.mrb[15].mxu1 }
 0x1ae   :  { %1332 = vst [vmem:[#allocation2 + $0x170] sm:$0xff] %v1197_v42 }
 0x1af   :  { %v1672_v43 = vpop.f32.mrb[14].mxu0 }
 0x1b0   :  { %1301 = vst [vmem:[#allocation2 + $0x78] sm:$0xff] %v1672_v43  ;;  %v1037_v44 = vpop.f32.mrb[15].mxu0 }
 0x1b1   :  { %1300 = vst [vmem:[#allocation2 + $0x70] sm:$0xff] %v1037_v44 }
 0x1b4   :  { %v1723_v45 = vpop.f32.mrb[16].mxu1 }
 0x1b5   :  { %1335 = vst [vmem:[#allocation2 + $0x188] sm:$0xff] %v1723_v45  ;;  %v1207_v46 = vpop.f32.mrb[17].mxu1 }
 0x1b6   :  { %1334 = vst [vmem:[#allocation2 + $0x180] sm:$0xff] %v1207_v46 }
 0x1b7   :  { %v1675_v18 = vpop.f32.mrb[16].mxu0 }
 0x1b8   :  { %1303 = vst [vmem:[#allocation2 + $0x88] sm:$0xff] %v1675_v18  ;;  %v1047_v47 = vpop.f32.mrb[17].mxu0 }
 0x1b9   :  { %1302 = vst [vmem:[#allocation2 + $0x80] sm:$0xff] %v1047_v47 }
 0x1bc   :  { %v1726_v48 = vpop.f32.mrb[18].mxu1 }
 0x1bd   :  { %1337 = vst [vmem:[#allocation2 + $0x198] sm:$0xff] %v1726_v48  ;;  %v1217_v20 = vpop.f32.mrb[19].mxu1 }
 0x1be   :  { %1336 = vst [vmem:[#allocation2 + $0x190] sm:$0xff] %v1217_v20 }
 0x1bf   :  { %v1678_v10 = vpop.f32.mrb[18].mxu0 }
 0x1c0   :  { %1305 = vst [vmem:[#allocation2 + $0x98] sm:$0xff] %v1678_v10  ;;  %v1057_v21 = vpop.f32.mrb[19].mxu0 }
 0x1c1   :  { %1304 = vst [vmem:[#allocation2 + $0x90] sm:$0xff] %v1057_v21 }
 0x1c4   :  { %v1729_v22 = vpop.f32.mrb[20].mxu1 }
 0x1c5   :  { %1339 = vst [vmem:[#allocation2 + $0x1a8] sm:$0xff] %v1729_v22  ;;  %v1227_v23 = vpop.f32.mrb[21].mxu1 }
 0x1c6   :  { %1338 = vst [vmem:[#allocation2 + $0x1a0] sm:$0xff] %v1227_v23 }
 0x1c7   :  { %v1681_v24 = vpop.f32.mrb[20].mxu0 }
 0x1c8   :  { %1307 = vst [vmem:[#allocation2 + $0xa8] sm:$0xff] %v1681_v24  ;;  %v1067_v49 = vpop.f32.mrb[21].mxu0 }
 0x1c9   :  { %1306 = vst [vmem:[#allocation2 + $0xa0] sm:$0xff] %v1067_v49 }
 0x1cc   :  { %v1732_v13 = vpop.f32.mrb[22].mxu1 }
 0x1cd   :  { %1341 = vst [vmem:[#allocation2 + $0x1b8] sm:$0xff] %v1732_v13  ;;  %v1237_v27 = vpop.f32.mrb[23].mxu1 }
 0x1ce   :  { %1340 = vst [vmem:[#allocation2 + $0x1b0] sm:$0xff] %v1237_v27 }
 0x1cf   :  { %v1684_v19 = vpop.f32.mrb[22].mxu0 }
 0x1d0   :  { %1309 = vst [vmem:[#allocation2 + $0xb8] sm:$0xff] %v1684_v19  ;;  %v1077_v33 = vpop.f32.mrb[23].mxu0 }
 0x1d1   :  { %1308 = vst [vmem:[#allocation2 + $0xb0] sm:$0xff] %v1077_v33 }
 0x1d4   :  { %v1735_v55 = vpop.f32.mrb[24].mxu1 }
 0x1d5   :  { %1343 = vst [vmem:[#allocation2 + $0x1c8] sm:$0xff] %v1735_v55  ;;  %v1247_v51 = vpop.f32.mrb[25].mxu1 }
 0x1d6   :  { %1342 = vst [vmem:[#allocation2 + $0x1c0] sm:$0xff] %v1247_v51 }
 0x1d7   :  { %v1687_v56 = vpop.f32.mrb[24].mxu0 }
 0x1d8   :  { %1311 = vst [vmem:[#allocation2 + $0xc8] sm:$0xff] %v1687_v56  ;;  %v1087_v25 = vpop.f32.mrb[25].mxu0 }
 0x1d9   :  { %1310 = vst [vmem:[#allocation2 + $0xc0] sm:$0xff] %v1087_v25 }
 0x1dc   :  { %v1738_v26 = vpop.f32.mrb[26].mxu1 }
 0x1dd   :  { %1345 = vst [vmem:[#allocation2 + $0x1d8] sm:$0xff] %v1738_v26  ;;  %v1257_v52 = vpop.f32.mrb[27].mxu1 }
 0x1de   :  { %1344 = vst [vmem:[#allocation2 + $0x1d0] sm:$0xff] %v1257_v52 }
 0x1df   :  { %v1690_v41 = vpop.f32.mrb[26].mxu0 }
 0x1e0   :  { %1313 = vst [vmem:[#allocation2 + $0xd8] sm:$0xff] %v1690_v41  ;;  %v1097_v57 = vpop.f32.mrb[27].mxu0 }
 0x1e1   :  { %1312 = vst [vmem:[#allocation2 + $0xd0] sm:$0xff] %v1097_v57 }
 0x1e4   :  { %v1741_v53 = vpop.f32.mrb[28].mxu1 }
 0x1e5   :  { %1347 = vst [vmem:[#allocation2 + $0x1e8] sm:$0xff] %v1741_v53  ;;  %v1267_v54 = vpop.f32.mrb[29].mxu1 }
 0x1e6   :  { %1346 = vst [vmem:[#allocation2 + $0x1e0] sm:$0xff] %v1267_v54 }
 0x1e7   :  { %v1693_v3 = vpop.f32.mrb[28].mxu0 }
 0x1e8   :  { %1315 = vst [vmem:[#allocation2 + $0xe8] sm:$0xff] %v1693_v3  ;;  %v1107_v4 = vpop.f32.mrb[29].mxu0 }
 0x1e9   :  { %1314 = vst [vmem:[#allocation2 + $0xe0] sm:$0xff] %v1107_v4 }
 0x1ec   :  { %v1744_v59 = vpop.f32.mrb[30].mxu1 }
 0x1ed   :  { %1349 = vst [vmem:[#allocation2 + $0x1f8] sm:$0xff] %v1744_v59  ;;  %v1277_v15 = vpop.f32.mrb[31].mxu1 }
 0x1ee   :  { %1348 = vst [vmem:[#allocation2 + $0x1f0] sm:$0xff] %v1277_v15 }
 0x1ef   :  { %v1696_v60 = vpop.f32.mrb[30].mxu0 }
 0x1f0   :  { %1317 = vst [vmem:[#allocation2 + $0xf8] sm:$0xff] %v1696_v60  ;;  %v1117_v63 = vpop.f32.mrb[31].mxu0 }
 0x1f1   :  { %1316 = vst [vmem:[#allocation2 + $0xf0] sm:$0xff] %v1117_v63 }
 0x1f2   :  { %1784 = shalt.err (!%p1781_p4)
}
 0x1f3   :  { %s1785_s8 = scalar_lea.hbm %s2427_s2, 8192 }
 0x1f4   :  { %p1786_p5 = scmp.ne.s32.totalorder %s2427_s2, %s1785_s8  ;;  %p1789_p6 = scmp.lt.u32.totalorder %s1785_s8, %s2427_s2 }
 0x1f6   :  { %p1791_p7 = pnand %p1789_p6, %p1786_p5 }
 0x1f8   :  { %1794 = shalt.err (!%p1791_p7)
}
 0x1f9   :  { %s1799_s13 = smov 128   ;;  %s1800_s14 = smov 8  }
 0x1fa   :  { %1361 = dma.vmem_to_hbm [thread:$0]  %s1356_s4, 8192, %s2427_s2, [#allocation3], %s1799_s13, %s1799_s13, %s1800_s14  }
 0x1fb   :  { %1795 = dma.done.wait [#allocation3], 8192  }
 0x1fc   :  { %1796 = vsyncadd [#allocation3], 4294959104 }
 0x1fd   :  { %1365 = vsyncpa [#allocation3], 1 }

</bundles_post_ra>
